<compile_context>
chip_gen: v7x
topology: tpu7x:2x2x1
jax: 0.10.0
libtpu: 0.0.40
codegen_flags: <defaults>
</compile_context>

<pallas_src>
import functools
import math

import jax
import jax.numpy as jnp
from jax import lax
from jax.experimental import pallas as pl
from jax.experimental.pallas import tpu as pltpu

EPS = 1e-5
NEG_SLOPE = 0.2


def _resblock_kernel(x_ref, w1_ref, b1_ref, t2_ref, b2_ref, gamma_ref, beta_ref,
                     t3_ref, b3_ref, g_ref, gt_ref, o_ref,
                     pad_ref, bn_ref, aff_ref, *, N, H, W, C):
    f32 = jnp.float32
    bf16 = jnp.bfloat16
    R = N * H                # dense rows
    L = W * C                # dense lane width (128 here) == MXU K for the convs
    P = N * H * W            # BN population size

    # Zero ONLY the two zero-pad border rows (once).  The interior rows 1..H are
    # fully overwritten by both conv3x3 calls, and there is no right lane-pad
    # block anymore (out-of-range width taps are dropped in the weights).
    zrow = jnp.zeros((N, 1, L), f32)
    pad_ref[:, 0:1, :] = zrow
    pad_ref[:, H + 1:H + 2, :] = zrow

    # ---- 1x1 "bottle" conv: one lane-dense bf16 matmul (R, W*Cin) @ (W*Cin, W*C)
    y = jnp.dot(x_ref[...], w1_ref[...],
                preferred_element_type=f32) + b1_ref[...]

    # ---- 3x3 conv (padding=1) as 3 lane-dense bf16 matmuls, one per kernel row.
    # The activation is written lane-aligned into the row-zero-padded scratch;
    # the kh (row) shift is a sublane-offset read, the kw (column) shift is
    # folded into the block-Toeplitz weight t_ref[kh] of shape (W*C, W*C).
    def conv3x3(act, t_ref, b_row):
        pad_ref[:, 1:H + 1, :] = act.reshape(N, H, L)
        acc = b_row + jnp.dot(pad_ref[:, 0:H, :].reshape(R, L).astype(bf16),
                              t_ref[0], preferred_element_type=f32)
        for kh in (1, 2):
            acc = acc + jnp.dot(pad_ref[:, kh:kh + H, :].reshape(R, L).astype(bf16),
                                t_ref[kh], preferred_element_type=f32)
        return acc

    c1 = conv3x3(y, t2_ref, b2_ref[...])

    # ---- BatchNorm2d (training mode: batch mean, biased variance), all f32 ----
    # Fused sum / sum-of-squares, packed into ONE (2, L) @ (L, C) dot; the
    # per-channel affine is broadcast back with ONE (2, C) @ (C, L) dot.
    bn_ref[0:1, :] = jnp.sum(c1, axis=0, keepdims=True)          # col sums
    bn_ref[1:2, :] = jnp.sum(c1 * c1, axis=0, keepdims=True)     # col sumsq
    stats_c = jnp.dot(bn_ref[...], g_ref[...],
                      preferred_element_type=f32)                # (2, C)
    mean_c = stats_c[0:1, :] * (1.0 / P)
    var_c = stats_c[1:2, :] * (1.0 / P) - mean_c * mean_c
    inv_c = lax.rsqrt(var_c + EPS)                               # EUP slot, f32
    aff_ref[0:1, :] = gamma_ref[...] * inv_c                     # scale
    aff_ref[1:2, :] = beta_ref[...] - mean_c * (gamma_ref[...] * inv_c)  # shift
    aff = jnp.dot(aff_ref[...], gt_ref[...],
                  preferred_element_type=f32)                    # (2, L)
    z = c1 * aff[0:1, :] + aff[1:2, :]

    # ---- LeakyReLU(0.2) ----
    a = jnp.where(z > 0, z, NEG_SLOPE * z)

    # ---- second 3x3 conv ----
    c2 = conv3x3(a, t3_ref, b3_ref[...])

    # ---- residual add + / sqrt(2); lane-dense (unmasked) f32 output store ----
    o_ref[...] = (c2 + y) * (1.0 / math.sqrt(2.0))


def _block_toeplitz_3x3(w_oihw, Wd):
    """(Cout, Cin, 3, 3) OIHW weights -> (3, Wd*Cin, Wd*Cout) per-row
    block-Toeplitz matrices acting on the lane-packed (w, ci) axis.
    Both left AND right out-of-range width taps are dropped in the weight,
    so no right lane-pad block is needed and K == Wd*Cin exactly."""
    mats = []
    for kh in range(3):
        t = None
        for kw in range(3):
            # sel[w_in, w_out] = 1 iff w_in == w_out + kw - 1 (in-range only)
            sel = jnp.eye(Wd, Wd, k=-(kw - 1), dtype=jnp.float32)
            blk = jnp.transpose(w_oihw[:, :, kh, kw])            # (Cin, Cout)
            term = jnp.kron(sel, blk)
            t = term if t is None else t + term
        mats.append(t)
    return jnp.stack(mats)                                       # (3, Wd*Ci, Wd*Co)


def pack_resblock_params(w1_oihw, b1, w2_oihw, b2, gamma, beta, w3_oihw, b3, *, W):
    """One-time weight packing (hoisted out of the per-call path)."""
    f32, bf16 = jnp.float32, jnp.bfloat16
    C = w1_oihw.shape[0]
    L = W * C
    # 1x1 conv -> block-diagonal lane-dense weight (W*Cin, W*C), bf16 MXU operand
    w1_dense = jnp.kron(jnp.eye(W, dtype=f32),
                        jnp.transpose(w1_oihw[:, :, 0, 0]).astype(f32)).astype(bf16)
    # 3x3 convs -> block-Toeplitz weights (one matrix per kernel row), bf16
    t2 = _block_toeplitz_3x3(w2_oihw.astype(f32), W).astype(bf16)
    t3 = _block_toeplitz_3x3(w3_oihw.astype(f32), W).astype(bf16)
    # per-channel vectors broadcast over the packed w-groups (kept f32)
    b1_dense = jnp.tile(b1.astype(f32), W).reshape(1, L)
    b2_dense = jnp.tile(b2.astype(f32), W).reshape(1, L)
    b3_dense = jnp.tile(b3.astype(f32), W).reshape(1, L)
    gamma_r = gamma.astype(f32).reshape(1, C)
    beta_r = beta.astype(f32).reshape(1, C)
    # BN channel gather / broadcast matrices for the lane-dense layout (f32)
    g_mat = jnp.kron(jnp.ones((W, 1), f32), jnp.eye(C, dtype=f32))    # (W*C, C)
    gt_mat = jnp.kron(jnp.ones((1, W), f32), jnp.eye(C, dtype=f32))   # (C, W*C)
    return (w1_dense, b1_dense, t2, b2_dense, gamma_r, beta_r, t3, b3_dense,
            g_mat, gt_mat)


@jax.jit
def resblock_apply(packed, x_nchw):
    (w1_dense, b1_dense, t2, b2_dense, gamma_r, beta_r,
     t3, b3_dense, g_mat, gt_mat) = packed
    N, Cin, H, W = x_nchw.shape
    C = gamma_r.shape[1]
    R, L = N * H, W * C
    f32 = jnp.float32

    # activation layout glue (per-call, plain XLA): NCHW -> lane-dense (N*H, W*C)
    x_dense = jnp.transpose(x_nchw.astype(f32), (0, 2, 3, 1)).reshape(
        R, W * Cin).astype(jnp.bfloat16)

    kernel = functools.partial(_resblock_kernel, N=N, H=H, W=W, C=C)
    vmem = pl.BlockSpec(memory_space=pltpu.MemorySpace.VMEM)

    flops = (2 * R * (W * Cin) * L                 # 1x1 conv
             + 2 * (3 * 2 * R * L * L)             # two 3x3 convs (3 dots each)
             + 2 * (2 * 2 * L * C)                 # BN pack/broadcast dots
             + 20 * R * L)                         # BN / LeakyReLU / residual
    bytes_accessed = (2 * R * W * Cin + 4 * R * L              # x (bf16) / out (f32)
                      + 2 * (W * Cin) * L + 2 * 2 * 3 * L * L  # bf16 weights
                      + 4 * (L * C + C * L + 3 * L + 2 * C))   # f32 small operands
    cost = pl.CostEstimate(flops=int(flops), transcendentals=int(C),
                           bytes_accessed=int(bytes_accessed))

    out_dense = pl.pallas_call(
        kernel,
        out_shape=jax.ShapeDtypeStruct((R, L), f32),
        in_specs=[vmem] * 11,
        out_specs=vmem,
        scratch_shapes=[pltpu.VMEM((N, H + 2, L), f32),   # row-padded conv scratch
                        pltpu.VMEM((2, L), f32),          # packed BN [sum; sumsq]
                        pltpu.VMEM((2, C), f32)],         # packed BN [scale; shift]
        cost_estimate=cost,
    )(x_dense, w1_dense, b1_dense, t2, b2_dense, gamma_r, beta_r,
      t3, b3_dense, g_mat, gt_mat)

    return jnp.transpose(out_dense.reshape(N, H, W, C), (0, 3, 1, 2))


def resblock_reference(x_nchw, w1_oihw, b1, w2_oihw, b2, gamma, beta, w3_oihw, b3):
    dn = ('NCHW', 'OIHW', 'NCHW')
    y = jax.lax.conv_general_dilated(x_nchw, w1_oihw, (1, 1), 'VALID',
                                     dimension_numbers=dn) + b1[None, :, None, None]
    c1 = jax.lax.conv_general_dilated(y, w2_oihw, (1, 1), ((1, 1), (1, 1)),
                                      dimension_numbers=dn) + b2[None, :, None, None]
    mean = jnp.mean(c1, axis=(0, 2, 3), keepdims=True)
    var = jnp.var(c1, axis=(0, 2, 3), keepdims=True)
    z = (c1 - mean) / jnp.sqrt(var + EPS) * gamma[None, :, None, None] + beta[None, :, None, None]
    a = jnp.where(z > 0, z, NEG_SLOPE * z)
    c2 = jax.lax.conv_general_dilated(a, w3_oihw, (1, 1), ((1, 1), (1, 1)),
                                      dimension_numbers=dn) + b3[None, :, None, None]
    return (c2 + y) / math.sqrt(2.0)


if __name__ == "__main__":
    key = jax.random.PRNGKey(0)
    N, Cin, Cout, H, W = 2, 4, 8, 16, 16

    ks = jax.random.split(key, 8)
    x = jax.random.normal(ks[0], (N, Cin, H, W), jnp.float32)
    w1 = 0.3 * jax.random.normal(ks[1], (Cout, Cin, 1, 1), jnp.float32)
    b1 = 0.1 * jax.random.normal(ks[2], (Cout,), jnp.float32)
    w2 = 0.1 * jax.random.normal(ks[3], (Cout, Cout, 3, 3), jnp.float32)
    b2 = 0.1 * jax.random.normal(ks[4], (Cout,), jnp.float32)
    w3 = 0.1 * jax.random.normal(ks[5], (Cout, Cout, 3, 3), jnp.float32)
    b3 = 0.1 * jax.random.normal(ks[6], (Cout,), jnp.float32)
    gamma = 1.0 + 0.1 * jax.random.normal(ks[7], (Cout,), jnp.float32)
    beta = jnp.zeros((Cout,), jnp.float32) + 0.05

    # Pack weights ONCE (steady-state callers reuse `packed` across invocations).
    packed = pack_resblock_params(w1, b1, w2, b2, gamma, beta, w3, b3, W=W)
    packed = jax.block_until_ready(packed)

    out = resblock_apply(packed, x)
    out = jax.block_until_ready(out)

    ref = resblock_reference(x, w1, b1, w2, b2, gamma, beta, w3, b3)
    assert out.shape == (N, Cout, H, W)
    # bf16 MXU operands (per perf review) with f32 accumulation / f32 BN stats:
    # tolerance relaxed accordingly vs. the pure-f32 variant.
    assert jnp.allclose(out, ref, atol=1e-2, rtol=1e-2), "mismatch vs JAX reference"

    print("KERNEL_OK")
</pallas_src>

<mosaic_0001>
module attributes {stable_mosaic.version = 11 : i64} {
  func.func @_resblock_kernel(%arg0: memref<32x64xbf16, #tpu.memory_space<vmem>>, %arg1: memref<64x128xbf16, #tpu.memory_space<vmem>>, %arg2: memref<1x128xf32, #tpu.memory_space<vmem>>, %arg3: memref<3x128x128xbf16, #tpu.memory_space<vmem>>, %arg4: memref<1x128xf32, #tpu.memory_space<vmem>>, %arg5: memref<1x8xf32, #tpu.memory_space<vmem>>, %arg6: memref<1x8xf32, #tpu.memory_space<vmem>>, %arg7: memref<3x128x128xbf16, #tpu.memory_space<vmem>>, %arg8: memref<1x128xf32, #tpu.memory_space<vmem>>, %arg9: memref<128x8xf32, #tpu.memory_space<vmem>>, %arg10: memref<8x128xf32, #tpu.memory_space<vmem>>, %arg11: memref<32x128xf32, #tpu.memory_space<vmem>>, %arg12: memref<2x18x128xf32, #tpu.memory_space<vmem>>, %arg13: memref<2x128xf32, #tpu.memory_space<vmem>>, %arg14: memref<2x8xf32, #tpu.memory_space<vmem>>) attributes {dimension_semantics = [], scalar_prefetch = 0 : i64, scratch_operands = 3 : i64, tpu.core_type = #tpu.core_type<tc>} {
    %cst = arith.constant 0.000000e+00 : f32
    %0 = vector.broadcast %cst : f32 to vector<2x1x128xf32>
    %c0 = arith.constant 0 : index
    %c0_0 = arith.constant 0 : index
    %c0_1 = arith.constant 0 : index
    %1 = vector.load %arg12[%c0, %c0_0, %c0_1] : memref<2x18x128xf32, #tpu.memory_space<vmem>>, vector<2x1x128xf32>
    tpu.vector_store %arg12[%c0, %c0_0, %c0_1], %0 {strides = array<i32>} : memref<2x18x128xf32, #tpu.memory_space<vmem>>, vector<2x1x128xf32>,
    %c0_2 = arith.constant 0 : index
    %c17 = arith.constant 17 : index
    %c0_3 = arith.constant 0 : index
    %2 = vector.load %arg12[%c0_2, %c17, %c0_3] : memref<2x18x128xf32, #tpu.memory_space<vmem>>, vector<2x1x128xf32>
    tpu.vector_store %arg12[%c0_2, %c17, %c0_3], %0 {strides = array<i32>} : memref<2x18x128xf32, #tpu.memory_space<vmem>>, vector<2x1x128xf32>,
    %c0_4 = arith.constant 0 : index
    %c0_5 = arith.constant 0 : index
    %3 = vector.load %arg0[%c0_4, %c0_5] : memref<32x64xbf16, #tpu.memory_space<vmem>>, vector<32x64xbf16>
    %c0_6 = arith.constant 0 : index
    %c0_7 = arith.constant 0 : index
    %4 = vector.load %arg1[%c0_6, %c0_7] : memref<64x128xbf16, #tpu.memory_space<vmem>>, vector<64x128xbf16>
    %cst_8 = arith.constant dense<0.000000e+00> : vector<32x128xf32>
    %5 = tpu.matmul %3, %4, %cst_8 {dimension_numbers = #tpu.dot_dimension_numbers<[1], [0], [0], [1], [0, 0, 1, 1], [], []>} : vector<32x64xbf16>, vector<64x128xbf16>, vector<32x128xf32> -> vector<32x128xf32>
    %c0_9 = arith.constant 0 : index
    %c0_10 = arith.constant 0 : index
    %6 = vector.load %arg2[%c0_9, %c0_10] : memref<1x128xf32, #tpu.memory_space<vmem>>, vector<1x128xf32>
    %7 = vector.broadcast %6 : vector<1x128xf32> to vector<32x128xf32>
    %8 = arith.addf %5, %7 : vector<32x128xf32>
    %c0_11 = arith.constant 0 : index
    %c0_12 = arith.constant 0 : index
    %9 = vector.load %arg4[%c0_11, %c0_12] : memref<1x128xf32, #tpu.memory_space<vmem>>, vector<1x128xf32>
    %10 = vector.shape_cast %8 : vector<32x128xf32> to vector<2x16x128xf32>
    %c0_13 = arith.constant 0 : index
    %c1 = arith.constant 1 : index
    %c0_14 = arith.constant 0 : index
    %11 = vector.load %arg12[%c0_13, %c1, %c0_14] : memref<2x18x128xf32, #tpu.memory_space<vmem>>, vector<2x16x128xf32>
    tpu.vector_store %arg12[%c0_13, %c1, %c0_14], %10 {strides = array<i32>} : memref<2x18x128xf32, #tpu.memory_space<vmem>>, vector<2x16x128xf32>,
    %c0_15 = arith.constant 0 : index
    %c0_16 = arith.constant 0 : index
    %c0_17 = arith.constant 0 : index
    %12 = vector.load %arg12[%c0_15, %c0_16, %c0_17] : memref<2x18x128xf32, #tpu.memory_space<vmem>>, vector<2x16x128xf32>
    %13 = vector.shape_cast %12 : vector<2x16x128xf32> to vector<32x128xf32>
    %14 = arith.truncf %13 : vector<32x128xf32> to vector<32x128xbf16>
    %c0_18 = arith.constant 0 : index
    %c0_19 = arith.constant 0 : index
    %c0_20 = arith.constant 0 : index
    %15 = vector.load %arg3[%c0_18, %c0_19, %c0_20] : memref<3x128x128xbf16, #tpu.memory_space<vmem>>, vector<1x128x128xbf16>
    %16 = vector.shape_cast %15 : vector<1x128x128xbf16> to vector<128x128xbf16>
    %cst_21 = arith.constant dense<0.000000e+00> : vector<32x128xf32>
    %17 = tpu.matmul %14, %16, %cst_21 {dimension_numbers = #tpu.dot_dimension_numbers<[1], [0], [0], [1], [0, 0, 1, 1], [], []>} : vector<32x128xbf16>, vector<128x128xbf16>, vector<32x128xf32> -> vector<32x128xf32>
    %18 = vector.broadcast %9 : vector<1x128xf32> to vector<32x128xf32>
    %19 = arith.addf %18, %17 : vector<32x128xf32>
    %c0_22 = arith.constant 0 : index
    %c1_23 = arith.constant 1 : index
    %c0_24 = arith.constant 0 : index
    %20 = vector.load %arg12[%c0_22, %c1_23, %c0_24] : memref<2x18x128xf32, #tpu.memory_space<vmem>>, vector<2x16x128xf32>
    %21 = vector.shape_cast %20 : vector<2x16x128xf32> to vector<32x128xf32>
    %22 = arith.truncf %21 : vector<32x128xf32> to vector<32x128xbf16>
    %c1_25 = arith.constant 1 : index
    %c0_26 = arith.constant 0 : index
    %c0_27 = arith.constant 0 : index
    %23 = vector.load %arg3[%c1_25, %c0_26, %c0_27] : memref<3x128x128xbf16, #tpu.memory_space<vmem>>, vector<1x128x128xbf16>
    %24 = vector.shape_cast %23 : vector<1x128x128xbf16> to vector<128x128xbf16>
    %cst_28 = arith.constant dense<0.000000e+00> : vector<32x128xf32>
    %25 = tpu.matmul %22, %24, %cst_28 {dimension_numbers = #tpu.dot_dimension_numbers<[1], [0], [0], [1], [0, 0, 1, 1], [], []>} : vector<32x128xbf16>, vector<128x128xbf16>, vector<32x128xf32> -> vector<32x128xf32>
    %26 = arith.addf %19, %25 : vector<32x128xf32>
    %c0_29 = arith.constant 0 : index
    %c2 = arith.constant 2 : index
    %c0_30 = arith.constant 0 : index
    %27 = vector.load %arg12[%c0_29, %c2, %c0_30] : memref<2x18x128xf32, #tpu.memory_space<vmem>>, vector<2x16x128xf32>
    %28 = vector.shape_cast %27 : vector<2x16x128xf32> to vector<32x128xf32>
    %29 = arith.truncf %28 : vector<32x128xf32> to vector<32x128xbf16>
    %c2_31 = arith.constant 2 : index
    %c0_32 = arith.constant 0 : index
    %c0_33 = arith.constant 0 : index
    %30 = vector.load %arg3[%c2_31, %c0_32, %c0_33] : memref<3x128x128xbf16, #tpu.memory_space<vmem>>, vector<1x128x128xbf16>
    %31 = vector.shape_cast %30 : vector<1x128x128xbf16> to vector<128x128xbf16>
    %cst_34 = arith.constant dense<0.000000e+00> : vector<32x128xf32>
    %32 = tpu.matmul %29, %31, %cst_34 {dimension_numbers = #tpu.dot_dimension_numbers<[1], [0], [0], [1], [0, 0, 1, 1], [], []>} : vector<32x128xbf16>, vector<128x128xbf16>, vector<32x128xf32> -> vector<32x128xf32>
    %33 = arith.addf %26, %32 : vector<32x128xf32>
    %cst_35 = arith.constant dense<0.000000e+00> : vector<128xf32>
    %34 = vector.multi_reduction <add>, %33, %cst_35 [0] : vector<32x128xf32> to vector<128xf32>
    %35 = vector.shape_cast %34 : vector<128xf32> to vector<1x128xf32>
    %c0_36 = arith.constant 0 : index
    %c0_37 = arith.constant 0 : index
    %36 = vector.load %arg13[%c0_36, %c0_37] : memref<2x128xf32, #tpu.memory_space<vmem>>, vector<1x128xf32>
    tpu.vector_store %arg13[%c0_36, %c0_37], %35 {strides = array<i32>} : memref<2x128xf32, #tpu.memory_space<vmem>>, vector<1x128xf32>,
    %37 = arith.mulf %33, %33 : vector<32x128xf32>
    %cst_38 = arith.constant dense<0.000000e+00> : vector<128xf32>
    %38 = vector.multi_reduction <add>, %37, %cst_38 [0] : vector<32x128xf32> to vector<128xf32>
    %39 = vector.shape_cast %38 : vector<128xf32> to vector<1x128xf32>
    %c1_39 = arith.constant 1 : index
    %c0_40 = arith.constant 0 : index
    %40 = vector.load %arg13[%c1_39, %c0_40] : memref<2x128xf32, #tpu.memory_space<vmem>>, vector<1x128xf32>
    tpu.vector_store %arg13[%c1_39, %c0_40], %39 {strides = array<i32>} : memref<2x128xf32, #tpu.memory_space<vmem>>, vector<1x128xf32>,
    %c0_41 = arith.constant 0 : index
    %c0_42 = arith.constant 0 : index
    %41 = vector.load %arg13[%c0_41, %c0_42] : memref<2x128xf32, #tpu.memory_space<vmem>>, vector<2x128xf32>
    %c0_43 = arith.constant 0 : index
    %c0_44 = arith.constant 0 : index
    %42 = vector.load %arg9[%c0_43, %c0_44] : memref<128x8xf32, #tpu.memory_space<vmem>>, vector<128x8xf32>
    %cst_45 = arith.constant dense<0.000000e+00> : vector<2x8xf32>
    %43 = tpu.matmul %41, %42, %cst_45 {dimension_numbers = #tpu.dot_dimension_numbers<[1], [0], [0], [1], [0, 0, 1, 1], [], []>} : vector<2x128xf32>, vector<128x8xf32>, vector<2x8xf32> -> vector<2x8xf32>
    %44 = vector.extract_strided_slice %43 {offsets = [0, 0], sizes = [1, 8], strides = [1, 1]} : vector<2x8xf32> to vector<1x8xf32>
    %cst_46 = arith.constant 0.001953125 : f32
    %45 = vector.broadcast %cst_46 : f32 to vector<1x8xf32>
    %46 = arith.mulf %44, %45 : vector<1x8xf32>
    %47 = vector.extract_strided_slice %43 {offsets = [1, 0], sizes = [1, 8], strides = [1, 1]} : vector<2x8xf32> to vector<1x8xf32>
    %cst_47 = arith.constant 0.001953125 : f32
    %48 = vector.broadcast %cst_47 : f32 to vector<1x8xf32>
    %49 = arith.mulf %47, %48 : vector<1x8xf32>
    %50 = arith.mulf %46, %46 : vector<1x8xf32>
    %51 = arith.subf %49, %50 : vector<1x8xf32>
    %cst_48 = arith.constant 9.99999974E-6 : f32
    %52 = vector.broadcast %cst_48 : f32 to vector<1x8xf32>
    %53 = arith.addf %51, %52 : vector<1x8xf32>
    %54 = math.rsqrt %53 : vector<1x8xf32>
    %c0_49 = arith.constant 0 : index
    %c0_50 = arith.constant 0 : index
    %55 = vector.load %arg5[%c0_49, %c0_50] : memref<1x8xf32, #tpu.memory_space<vmem>>, vector<1x8xf32>
    %56 = arith.mulf %55, %54 : vector<1x8xf32>
    %c0_51 = arith.constant 0 : index
    %c0_52 = arith.constant 0 : index
    %57 = vector.load %arg14[%c0_51, %c0_52] : memref<2x8xf32, #tpu.memory_space<vmem>>, vector<1x8xf32>
    tpu.vector_store %arg14[%c0_51, %c0_52], %56 {strides = array<i32>} : memref<2x8xf32, #tpu.memory_space<vmem>>, vector<1x8xf32>,
    %c0_53 = arith.constant 0 : index
    %c0_54 = arith.constant 0 : index
    %58 = vector.load %arg6[%c0_53, %c0_54] : memref<1x8xf32, #tpu.memory_space<vmem>>, vector<1x8xf32>
    %c0_55 = arith.constant 0 : index
    %c0_56 = arith.constant 0 : index
    %59 = vector.load %arg5[%c0_55, %c0_56] : memref<1x8xf32, #tpu.memory_space<vmem>>, vector<1x8xf32>
    %60 = arith.mulf %59, %54 : vector<1x8xf32>
    %61 = arith.mulf %46, %60 : vector<1x8xf32>
    %62 = arith.subf %58, %61 : vector<1x8xf32>
    %c1_57 = arith.constant 1 : index
    %c0_58 = arith.constant 0 : index
    %63 = vector.load %arg14[%c1_57, %c0_58] : memref<2x8xf32, #tpu.memory_space<vmem>>, vector<1x8xf32>
    tpu.vector_store %arg14[%c1_57, %c0_58], %62 {strides = array<i32>} : memref<2x8xf32, #tpu.memory_space<vmem>>, vector<1x8xf32>,
    %c0_59 = arith.constant 0 : index
    %c0_60 = arith.constant 0 : index
    %64 = vector.load %arg14[%c0_59, %c0_60] : memref<2x8xf32, #tpu.memory_space<vmem>>, vector<2x8xf32>
    %c0_61 = arith.constant 0 : index
    %c0_62 = arith.constant 0 : index
    %65 = vector.load %arg10[%c0_61, %c0_62] : memref<8x128xf32, #tpu.memory_space<vmem>>, vector<8x128xf32>
    %cst_63 = arith.constant dense<0.000000e+00> : vector<2x128xf32>
    %66 = tpu.matmul %64, %65, %cst_63 {dimension_numbers = #tpu.dot_dimension_numbers<[1], [0], [0], [1], [0, 0, 1, 1], [], []>} : vector<2x8xf32>, vector<8x128xf32>, vector<2x128xf32> -> vector<2x128xf32>
    %67 = vector.extract_strided_slice %66 {offsets = [0, 0], sizes = [1, 128], strides = [1, 1]} : vector<2x128xf32> to vector<1x128xf32>
    %68 = vector.broadcast %67 : vector<1x128xf32> to vector<32x128xf32>
    %69 = arith.mulf %33, %68 : vector<32x128xf32>
    %70 = vector.extract_strided_slice %66 {offsets = [1, 0], sizes = [1, 128], strides = [1, 1]} : vector<2x128xf32> to vector<1x128xf32>
    %71 = vector.broadcast %70 : vector<1x128xf32> to vector<32x128xf32>
    %72 = arith.addf %69, %71 : vector<32x128xf32>
    %cst_64 = arith.constant 0.000000e+00 : f32
    %73 = vector.broadcast %cst_64 : f32 to vector<32x128xf32>
    %74 = arith.cmpf ogt, %72, %73 : vector<32x128xf32>
    %cst_65 = arith.constant 2.000000e-01 : f32
    %75 = vector.broadcast %cst_65 : f32 to vector<32x128xf32>
    %76 = arith.mulf %75, %72 : vector<32x128xf32>
    %77 = arith.select %74, %72, %76 : vector<32x128xi1>, vector<32x128xf32>
    %c0_66 = arith.constant 0 : index
    %c0_67 = arith.constant 0 : index
    %78 = vector.load %arg8[%c0_66, %c0_67] : memref<1x128xf32, #tpu.memory_space<vmem>>, vector<1x128xf32>
    %79 = vector.shape_cast %77 : vector<32x128xf32> to vector<2x16x128xf32>
    %c0_68 = arith.constant 0 : index
    %c1_69 = arith.constant 1 : index
    %c0_70 = arith.constant 0 : index
    %80 = vector.load %arg12[%c0_68, %c1_69, %c0_70] : memref<2x18x128xf32, #tpu.memory_space<vmem>>, vector<2x16x128xf32>
    tpu.vector_store %arg12[%c0_68, %c1_69, %c0_70], %79 {strides = array<i32>} : memref<2x18x128xf32, #tpu.memory_space<vmem>>, vector<2x16x128xf32>,
    %c0_71 = arith.constant 0 : index
    %c0_72 = arith.constant 0 : index
    %c0_73 = arith.constant 0 : index
    %81 = vector.load %arg12[%c0_71, %c0_72, %c0_73] : memref<2x18x128xf32, #tpu.memory_space<vmem>>, vector<2x16x128xf32>
    %82 = vector.shape_cast %81 : vector<2x16x128xf32> to vector<32x128xf32>
    %83 = arith.truncf %82 : vector<32x128xf32> to vector<32x128xbf16>
    %c0_74 = arith.constant 0 : index
    %c0_75 = arith.constant 0 : index
    %c0_76 = arith.constant 0 : index
    %84 = vector.load %arg7[%c0_74, %c0_75, %c0_76] : memref<3x128x128xbf16, #tpu.memory_space<vmem>>, vector<1x128x128xbf16>
    %85 = vector.shape_cast %84 : vector<1x128x128xbf16> to vector<128x128xbf16>
    %cst_77 = arith.constant dense<0.000000e+00> : vector<32x128xf32>
    %86 = tpu.matmul %83, %85, %cst_77 {dimension_numbers = #tpu.dot_dimension_numbers<[1], [0], [0], [1], [0, 0, 1, 1], [], []>} : vector<32x128xbf16>, vector<128x128xbf16>, vector<32x128xf32> -> vector<32x128xf32>
    %87 = vector.broadcast %78 : vector<1x128xf32> to vector<32x128xf32>
    %88 = arith.addf %87, %86 : vector<32x128xf32>
    %c0_78 = arith.constant 0 : index
    %c1_79 = arith.constant 1 : index
    %c0_80 = arith.constant 0 : index
    %89 = vector.load %arg12[%c0_78, %c1_79, %c0_80] : memref<2x18x128xf32, #tpu.memory_space<vmem>>, vector<2x16x128xf32>
    %90 = vector.shape_cast %89 : vector<2x16x128xf32> to vector<32x128xf32>
    %91 = arith.truncf %90 : vector<32x128xf32> to vector<32x128xbf16>
    %c1_81 = arith.constant 1 : index
    %c0_82 = arith.constant 0 : index
    %c0_83 = arith.constant 0 : index
    %92 = vector.load %arg7[%c1_81, %c0_82, %c0_83] : memref<3x128x128xbf16, #tpu.memory_space<vmem>>, vector<1x128x128xbf16>
    %93 = vector.shape_cast %92 : vector<1x128x128xbf16> to vector<128x128xbf16>
    %cst_84 = arith.constant dense<0.000000e+00> : vector<32x128xf32>
    %94 = tpu.matmul %91, %93, %cst_84 {dimension_numbers = #tpu.dot_dimension_numbers<[1], [0], [0], [1], [0, 0, 1, 1], [], []>} : vector<32x128xbf16>, vector<128x128xbf16>, vector<32x128xf32> -> vector<32x128xf32>
    %95 = arith.addf %88, %94 : vector<32x128xf32>
    %c0_85 = arith.constant 0 : index
    %c2_86 = arith.constant 2 : index
    %c0_87 = arith.constant 0 : index
    %96 = vector.load %arg12[%c0_85, %c2_86, %c0_87] : memref<2x18x128xf32, #tpu.memory_space<vmem>>, vector<2x16x128xf32>
    %97 = vector.shape_cast %96 : vector<2x16x128xf32> to vector<32x128xf32>
    %98 = arith.truncf %97 : vector<32x128xf32> to vector<32x128xbf16>
    %c2_88 = arith.constant 2 : index
    %c0_89 = arith.constant 0 : index
    %c0_90 = arith.constant 0 : index
    %99 = vector.load %arg7[%c2_88, %c0_89, %c0_90] : memref<3x128x128xbf16, #tpu.memory_space<vmem>>, vector<1x128x128xbf16>
    %100 = vector.shape_cast %99 : vector<1x128x128xbf16> to vector<128x128xbf16>
    %cst_91 = arith.constant dense<0.000000e+00> : vector<32x128xf32>
    %101 = tpu.matmul %98, %100, %cst_91 {dimension_numbers = #tpu.dot_dimension_numbers<[1], [0], [0], [1], [0, 0, 1, 1], [], []>} : vector<32x128xbf16>, vector<128x128xbf16>, vector<32x128xf32> -> vector<32x128xf32>
    %102 = arith.addf %95, %101 : vector<32x128xf32>
    %103 = arith.addf %102, %8 : vector<32x128xf32>
    %cst_92 = arith.constant 0.707106769 : f32
    %104 = vector.broadcast %cst_92 : f32 to vector<32x128xf32>
    %105 = arith.mulf %103, %104 : vector<32x128xf32>
    %c0_93 = arith.constant 0 : index
    %c0_94 = arith.constant 0 : index
    %106 = vector.load %arg11[%c0_93, %c0_94] : memref<32x128xf32, #tpu.memory_space<vmem>>, vector<32x128xf32>
    tpu.vector_store %arg11[%c0_93, %c0_94], %105 {strides = array<i32>} : memref<32x128xf32, #tpu.memory_space<vmem>>, vector<32x128xf32>,
    return
  }
}

</mosaic_0001>

<bundles_post_ra>
// kernel: resblock_apply.1
= control target key start
LH: loop header
LB: loop body
LE: loop exit
PB: predicated region body
PF: predicated region fallthrough
CT: control target
= control target key end

     0   :  { %vm96_vm0 = vcmask 523264   ;;  %v1671_v12 = vmov 0.0   ;;  %v1672_v57 = vmov 0.0|0.0   ;;  %vm1673_vm1 = vmmov 0   ;;  %s2031_s1 = inlined_call_operand.vmem [shape: bf16[64,128], index: 1, kind: input, shape index: {}]   ;;  %s2032_s0 = inlined_call_operand.vmem [shape: bf16[32,64], index: 0, kind: input, shape index: {}]   ;;  %s2033_s3 = inlined_call_operand.vmem [shape: bf16[3,128,128], index: 3, kind: input, shape index: {}]   ;;  %s2034_s2 = inlined_call_operand.vmem [shape: f32[1,128], index: 2, kind: input, shape index: {}]   ;;  %s2035_s9 = inlined_call_operand.vmem [shape: f32[128,8], index: 9, kind: input, shape index: {}]   ;;  %s2036_s4 = inlined_call_operand.vmem [shape: f32[1,128], index: 4, kind: input, shape index: {}]   ;;  %s2037_s10 = inlined_call_operand.vmem [shape: f32[8,128], index: 10, kind: input, shape index: {}]   ;;  %s2038_s7 = inlined_call_operand.vmem [shape: bf16[3,128,128], index: 7, kind: input, shape index: {}]   ;;  %s2039_s5 = inlined_call_operand.vmem [shape: f32[1,8], index: 5, kind: input, shape index: {}]   ;;  %s2040_s6 = inlined_call_operand.vmem [shape: f32[1,8], index: 6, kind: input, shape index: {}]   ;;  %s2041_s8 = inlined_call_operand.vmem [shape: f32[1,128], index: 8, kind: input, shape index: {}]   ;;  %s2042_s11 = inlined_call_operand.vmem [shape: f32[32,128], index: 11, kind: output, shape index: {}]  }
   0x1   :  { %v1615_v0 = vld [vmem:[%s2031_s1] sm:$0xff]   ;;  %v1616_v1 = vld [vmem:[%s2031_s1 + $0x8] sm:$0xff]   ;;  %v1617_v2 = vld [vmem:[%s2031_s1 + $0x10] sm:$0xff]   ;;  %39 = vst [vmem:[#allocation2] sm:$0x1] %v1671_v12  ;;  %vm672_vm2 = vcmask 57344  }
   0x2   :  { %1391 = vmatprep.subr.bf16.mxu0 %v1615_v0  ;;  %v1619_v3 = vld [vmem:[%s2032_s0] sm:$0xff]   ;;  %v1622_v5 = vld [vmem:[%s2033_s3 + $0x8] sm:$0xff]   ;;  %v1618_v6 = vld [vmem:[%s2031_s1 + $0x18] sm:$0xff]   ;;  %40 = vst [vmem:[#allocation2 + $0x18] sm:$0x1] %v1671_v12  ;;  %vm682_vm3 = vcmask 64512  }
   0x3   :  { %1392 = vmatpush3.bf16.msra.mxu0 %v1615_v0  ;;  %1399 = vmatprep.mubr.msk.bf16.mxu0 %vm96_vm0, %v1619_v3  ;;  %v1621_v4 = vld [vmem:[%s2033_s3] sm:$0xff]   ;;  %v1623_v7 = vld [vmem:[%s2033_s3 + $0x10] sm:$0xff]   ;;  %v1620_v8 = vld [vmem:[%s2032_s0 + $0x8] sm:$0xff]   ;;  %41 = vst [vmem:[#allocation2 + $0x11] sm:$0x1] %v1671_v12 }
   0x4   :  { %1393 = vmatprep.subr.bf16.mxu0 %v1616_v1  ;;  %1403 = vmatprep.subr.bf16.mxu1 %v1621_v4  ;;  %v1624_v9 = vld [vmem:[%s2033_s3 + $0x18] sm:$0xff]   ;;  %v1625_v10 = vld [vmem:[%s2033_s3 + $0x20] sm:$0xff]   ;;  %v1626_v11 = vld [vmem:[%s2033_s3 + $0x28] sm:$0xff]   ;;  %42 = vst [vmem:[#allocation2 + $0x29] sm:$0x1] %v1671_v12 }
   0x5   :  { %1404 = vmatpush3.bf16.msra.mxu1 %v1621_v4  ;;  %v1627_v13 = vld [vmem:[%s2033_s3 + $0x30] sm:$0xff]   ;;  %v1628_v14 = vld [vmem:[%s2033_s3 + $0x38] sm:$0xff]   ;;  %v1629_v15 = vld [vmem:[%s2033_s3 + $0x40] sm:$0xff]  }
   0x6   :  { %1405 = vmatprep.subr.bf16.mxu1 %v1622_v5  ;;  %v1182_v16 = vld [vmem:[%s2034_s2] ss:$0 sm:$0xff]  ;;  %v1630_v31 = vld [vmem:[%s2033_s3 + $0x48] sm:$0xff]   ;;  %v1631_v33 = vld [vmem:[%s2033_s3 + $0x50] sm:$0xff]  }
   0x7   :  { %1394 = vmatpush3.bf16.msra.mxu0 %v1616_v1  ;;  %v1632_v34 = vld [vmem:[%s2033_s3 + $0x58] sm:$0xff]   ;;  %v1633_v35 = vld [vmem:[%s2033_s3 + $0x60] sm:$0xff]   ;;  %v1634_v36 = vld [vmem:[%s2033_s3 + $0x68] sm:$0xff]  }
   0x8   :  { %1395 = vmatprep.subr.bf16.mxu0 %v1617_v2  ;;  %v1635_v37 = vld [vmem:[%s2033_s3 + $0x70] sm:$0xff]   ;;  %v1636_v38 = vld [vmem:[%s2033_s3 + $0x78] sm:$0xff]   ;;  %v1637_v39 = vld [vmem:[%s2033_s3 + $0x80] sm:$0xff]  }
   0x9   :  { %1406 = vmatpush3.bf16.msra.mxu1 %v1622_v5  ;;  %v1638_v43 = vld [vmem:[%s2033_s3 + $0x88] sm:$0xff]   ;;  %v1639_v45 = vld [vmem:[%s2033_s3 + $0x90] sm:$0xff]   ;;  %v1640_v46 = vld [vmem:[%s2033_s3 + $0x98] sm:$0xff]  }
   0xa   :  { %1407 = vmatprep.subr.bf16.mxu1 %v1623_v7  ;;  %v1641_v47 = vld [vmem:[%s2033_s3 + $0xa0] sm:$0xff]   ;;  %v1642_v48 = vld [vmem:[%s2033_s3 + $0xa8] sm:$0xff]   ;;  %v1643_v49 = vld [vmem:[%s2033_s3 + $0xb0] sm:$0xff]  }
   0xb   :  { %1396 = vmatpush3.bf16.msra.mxu0 %v1617_v2  ;;  %v1644_v50 = vld [vmem:[%s2033_s3 + $0xb8] sm:$0xff]   ;;  %v559_v54 = vld [vmem:[%s2035_s9] sm:$0xff]  ;;  %v560_v55 = vld [vmem:[%s2035_s9 + $0x8] sm:$0xff] }
   0xc   :  { %1397 = vmatprep.subr.bf16.mxu0 %v1618_v6  ;;  %v1564_v56 = vpack.c.bf16 %v560_v55, %v559_v54  ;;  %v561_v58 = vld [vmem:[%s2035_s9 + $0x10] sm:$0xff]  ;;  %v562_v59 = vld [vmem:[%s2035_s9 + $0x18] sm:$0xff]  ;;  %v563_v61 = vld [vmem:[%s2035_s9 + $0x20] sm:$0xff] }
   0xd   :  { %1408 = vmatpush3.bf16.msra.mxu1 %v1623_v7  ;;  %v1567_v60 = vpack.c.bf16 %v562_v59, %v561_v58  ;;  %v564_v62 = vld [vmem:[%s2035_s9 + $0x28] sm:$0xff]  ;;  %v565_v0 = vld [vmem:[%s2035_s9 + $0x30] sm:$0xff]  ;;  %v566_v1 = vld [vmem:[%s2035_s9 + $0x38] sm:$0xff] }
   0xe   :  { %1409 = vmatprep.subr.bf16.mxu1 %v1624_v9  ;;  %v1570_v63 = vpack.c.bf16 %v564_v62, %v563_v61  ;;  %v1573_v2 = vpack.c.bf16 %v566_v1, %v565_v0  ;;  %v567_v3 = vld [vmem:[%s2035_s9 + $0x40] sm:$0xff]  ;;  %v568_v4 = vld [vmem:[%s2035_s9 + $0x48] sm:$0xff]  ;;  %v570_v7 = vld [vmem:[%s2035_s9 + $0x58] sm:$0xff]  ;;  %v658_v62 = vlaneseq }
   0xf   :  { %1398 = vmatpush3.bf16.msra.mxu0 %v1618_v6  ;;  %v1576_v5 = vpack.c.bf16 %v568_v4, %v567_v3  ;;  %v569_v6 = vld [vmem:[%s2035_s9 + $0x50] sm:$0xff] }
  0x10   :  { %1498 = vmatprep.subr.mxu0 %v1671_v12  ;;  %v659_v0 = vshrl.u32 %v658_v62, 7  ;;  %v1661_v62 = vld [vmem:[%s2038_s7 + $0x80] sm:$0xff]  }
  0x11   :  { %1410 = vmatpush3.bf16.msra.mxu1 %v1624_v9  ;;  %v571_v9 = vld [vmem:[%s2035_s9 + $0x60] sm:$0xff] }
  0x12   :  { %1400 = vmatmul.mubr.msk.bf16.vlgmr.msra.gmra.mrb[0].mxu0 %vm96_vm0, %v1620_v8  ;;  %1411 = vmatprep.subr.bf16.mxu1 %v1625_v10  ;;  %v1579_v8 = vpack.c.bf16 %v570_v7, %v569_v6  ;;  %v675_v6 = vld [vmem:[%s2039_s5] sm:$0x1] }
  0x13   :  { %1500 = vmatprep.mubr.msk.f32.mxu0 %vm1673_vm1, %v1671_v12 }
  0x15   :  { %1412 = vmatpush3.bf16.msra.mxu1 %v1625_v10  ;;  %v572_v10 = vld [vmem:[%s2035_s9 + $0x68] sm:$0xff] }
  0x16   :  { %1413 = vmatprep.subr.bf16.mxu1 %v1626_v11 }
  0x19   :  { %1414 = vmatpush3.bf16.msra.mxu1 %v1626_v11  ;;  %v1582_v11 = vpack.c.bf16 %v572_v10, %v571_v9  ;;  %v674_v10 = vld [vmem:[%s2040_s6] sm:$0x1] }
  0x1a   :  { %1415 = vmatprep.subr.bf16.mxu1 %v1627_v13 }
  0x1d   :  { %1416 = vmatpush3.bf16.msra.mxu1 %v1627_v13  ;;  %v573_v13 = vld [vmem:[%s2035_s9 + $0x70] sm:$0xff] }
  0x1e   :  { %1417 = vmatprep.subr.bf16.mxu1 %v1628_v14 }
  0x21   :  { %1418 = vmatpush3.bf16.msra.mxu1 %v1628_v14  ;;  %v574_v14 = vld [vmem:[%s2035_s9 + $0x78] sm:$0xff] }
  0x22   :  { %1423 = vmatprep.subr.bf16.mxu1 %v1629_v15 }
  0xe5   :  { %v1401_v17 = vpop.f32.mrb[0].mxu0 }
  0xe6   :  { %v1790_v18 = vadd.f32 %v1401_v17, %v1182_v16  ;;  %v137_v19 = vpop.f32.mrb[1].mxu0 }
  0xe7   :  { %v1792_v20 = vadd.f32 %v1182_v16, %v137_v19  ;;  %v1402_v21 = vpop.f32.mrb[2].mxu0 }
  0xe8   :  { %155 = vst [vmem:[#allocation2 + $0x19] sm:$0xff] %v1790_v18  ;;  %v1795_v22 = vadd.f32 %v1402_v21, %v1182_v16  ;;  %v140_v23 = vpop.f32.mrb[3].mxu0 }
  0xe9   :  { %153 = vst [vmem:[#allocation2 + $0x1] sm:$0xff] %v1792_v20  ;;  %v1798_v24 = vadd.f32 %v1182_v16, %v140_v23  ;;  %v1199_v16 = vld [vmem:[%s2036_s4] ss:$0 sm:$0xff] }
  0xea   :  { %156 = vst [vmem:[#allocation2 + $0x21] sm:$0xff] %v1795_v22  ;;  %v291_v42 = vpack.c.bf16 %v1795_v22, %v1790_v18 }
  0xeb   :  { %154 = vst [vmem:[#allocation2 + $0x9] sm:$0xff] %v1798_v24  ;;  %v290_v32 = vpack.c.bf16 %v1798_v24, %v1792_v20 }
  0xef   :  { %v159_v29 = vld [vmem:[#allocation2 + $0x18] sm:$0xff] }
  0xf0   :  { %v157_v26 = vld [vmem:[#allocation2] sm:$0xff] }
  0xf1   :  { %v160_v25 = vld [vmem:[#allocation2 + $0x20] sm:$0xff] }
  0xf2   :  { %v158_v27 = vld [vmem:[#allocation2 + $0x8] sm:$0xff]  ;;  %v162_v30 = vpack.c.bf16 %v160_v25, %v159_v29  ;;  %v412_v51 = vld [vmem:[#allocation2 + $0x1a] sm:$0xff] }
  0xf3   :  { %v161_v28 = vpack.c.bf16 %v158_v27, %v157_v26  ;;  %v410_v40 = vld [vmem:[#allocation2 + $0x2] sm:$0xff]  ;;  %v411_v41 = vld [vmem:[#allocation2 + $0xa] sm:$0xff] }
  0xf4   :  { %v414_v44 = vpack.c.bf16 %v411_v41, %v410_v40  ;;  %v413_v52 = vld [vmem:[#allocation2 + $0x22] sm:$0xff] }
  0xf5   :  { %1419 = vmatprep.mubr.bf16.mxu1 %v161_v28  ;;  %v415_v53 = vpack.c.bf16 %v413_v52, %v412_v51  ;;  %v681_v51 = vld [vmem:[%s2037_s10] sm:$0xff] }
  0xf6   :  { %1420 = vmatmul.mubr.bf16.vlgmr.msra.gmra.mrb[0].mxu1 %v162_v30  ;;  %1499 = vmatpush3.msra.mxu0 %v681_v51  ;;  %v1645_v52 = vld [vmem:[%s2038_s7] sm:$0xff]  }
  0xf7   :  { %1424 = vmatpush3.bf16.msra.mxu1 %v1629_v15  ;;  %1439 = vmatprep.mubr.bf16.mxu1 %v290_v32  ;;  %v1585_v15 = vpack.c.bf16 %v574_v14, %v573_v13  ;;  %v1646_v14 = vld [vmem:[%s2038_s7 + $0x8] sm:$0xff]  }
  0xf8   :  { %1425 = vmatprep.subr.bf16.mxu1 %v1630_v31  ;;  %1503 = vmatprep.subr.bf16.mxu0 %v1645_v52 }
  0xfb   :  { %1426 = vmatpush3.bf16.msra.mxu1 %v1630_v31 }
  0xfc   :  { %1427 = vmatprep.subr.bf16.mxu1 %v1631_v33 }
  0xff   :  { %1428 = vmatpush3.bf16.msra.mxu1 %v1631_v33 }
 0x100   :  { %1429 = vmatprep.subr.bf16.mxu1 %v1632_v34 }
 0x103   :  { %1430 = vmatpush3.bf16.msra.mxu1 %v1632_v34 }
 0x104   :  { %1431 = vmatprep.subr.bf16.mxu1 %v1633_v35 }
 0x107   :  { %1432 = vmatpush3.bf16.msra.mxu1 %v1633_v35 }
 0x108   :  { %1433 = vmatprep.subr.bf16.mxu1 %v1634_v36 }
 0x10b   :  { %1434 = vmatpush3.bf16.msra.mxu1 %v1634_v36 }
 0x10c   :  { %1435 = vmatprep.subr.bf16.mxu1 %v1635_v37 }
 0x10f   :  { %1436 = vmatpush3.bf16.msra.mxu1 %v1635_v37 }
 0x110   :  { %1437 = vmatprep.subr.bf16.mxu1 %v1636_v38 }
 0x113   :  { %1438 = vmatpush3.bf16.msra.mxu1 %v1636_v38 }
 0x114   :  { %1443 = vmatprep.subr.bf16.mxu1 %v1637_v39 }
 0x116   :  { %1440 = vmatmul.mubr.bf16.vlgmr.msra.gmra.mrb[0].mxu1 %v291_v42 }
 0x117   :  { %1444 = vmatpush3.bf16.msra.mxu1 %v1637_v39  ;;  %1459 = vmatprep.mubr.bf16.mxu1 %v414_v44 }
 0x118   :  { %1445 = vmatprep.subr.bf16.mxu1 %v1638_v43 }
 0x11b   :  { %1446 = vmatpush3.bf16.msra.mxu1 %v1638_v43 }
 0x11c   :  { %1447 = vmatprep.subr.bf16.mxu1 %v1639_v45 }
 0x11f   :  { %1448 = vmatpush3.bf16.msra.mxu1 %v1639_v45 }
 0x120   :  { %1449 = vmatprep.subr.bf16.mxu1 %v1640_v46 }
 0x123   :  { %1450 = vmatpush3.bf16.msra.mxu1 %v1640_v46 }
 0x124   :  { %1451 = vmatprep.subr.bf16.mxu1 %v1641_v47 }
 0x127   :  { %1452 = vmatpush3.bf16.msra.mxu1 %v1641_v47 }
 0x128   :  { %1453 = vmatprep.subr.bf16.mxu1 %v1642_v48 }
 0x12b   :  { %1454 = vmatpush3.bf16.msra.mxu1 %v1642_v48 }
 0x12c   :  { %1455 = vmatprep.subr.bf16.mxu1 %v1643_v49 }
 0x12f   :  { %1456 = vmatpush3.bf16.msra.mxu1 %v1643_v49 }
 0x130   :  { %1457 = vmatprep.subr.bf16.mxu1 %v1644_v50 }
 0x133   :  { %1458 = vmatpush3.bf16.msra.mxu1 %v1644_v50 }
 0x134   :  { %1563 = vmatprep.subr.bf16.mxu1 %v1672_v57 }
 0x136   :  { %1460 = vmatmul.mubr.bf16.vlgmr.msra.gmra.mrb[0].mxu1 %v415_v53 }
 0x137   :  { %1565 = vmatpush3.bf16.msra.mxu1 %v1564_v56  ;;  %1495 = vmatprep.mubr.msk.f32.mxu1 %vm1673_vm1, %v1671_v12 }
 0x138   :  { %1566 = vmatprep.subr.bf16.mxu1 %v1672_v57 }
 0x13b   :  { %1568 = vmatpush3.bf16.msra.mxu1 %v1567_v60  ;;  %v1674_v60 = vmov 1966171168  }
 0x13c   :  { %1569 = vmatprep.subr.bf16.mxu1 %v1672_v57  ;;  %v656_v61 = vunpack.c.l.s4 %v1674_v60  ;;  %v1659_v60 = vld [vmem:[%s2038_s7 + $0x70] sm:$0xff]  }
 0x13f   :  { %1571 = vmatpush3.bf16.msra.mxu1 %v1570_v63  ;;  %v657_v63 = vunpack.c.0.s8 %v656_v61  ;;  %v1660_v61 = vld [vmem:[%s2038_s7 + $0x78] sm:$0xff]  }
 0x140   :  { %1572 = vmatprep.subr.bf16.mxu1 %v1672_v57 }
 0x141   :  { %v660_v1 = vsub.s32 %v657_v63, %v659_v0 }
 0x143   :  { %1574 = vmatpush3.bf16.msra.mxu1 %v1573_v2 }
 0x144   :  { %1575 = vmatprep.subr.bf16.mxu1 %v1672_v57 }
 0x147   :  { %1577 = vmatpush3.bf16.msra.mxu1 %v1576_v5  ;;  %v653_v5 = vld [vmem:[%s2039_s5] sm:$0x1] }
 0x148   :  { %1578 = vmatprep.subr.bf16.mxu1 %v1672_v57 }
 0x14b   :  { %1580 = vmatpush3.bf16.msra.mxu1 %v1579_v8 }
 0x14c   :  { %1581 = vmatprep.subr.bf16.mxu1 %v1672_v57 }
 0x14f   :  { %1583 = vmatpush3.bf16.msra.mxu1 %v1582_v11 }
 0x150   :  { %1584 = vmatprep.subr.bf16.mxu1 %v1672_v57 }
 0x153   :  { %1586 = vmatpush3.bf16.msra.mxu1 %v1585_v15 }
 0x209   :  { %v1461_v17 = vpop.f32.mrb[0].mxu1 }
 0x20a   :  { %v515_v19 = vpop.f32.mrb[1].mxu1  ;;  %v1906_v26 = vadd.f32 %v1461_v17, %v1199_v16  ;;  %v1648_v17 = vld [vmem:[%s2038_s7 + $0x18] sm:$0xff]  }
 0x20b   :  { %v1904_v21 = vadd.f32 %v1199_v16, %v515_v19  ;;  %v1462_v23 = vpop.f32.mrb[2].mxu1  ;;  %v1649_v19 = vld [vmem:[%s2038_s7 + $0x20] sm:$0xff]  }
 0x20c   :  { %v518_v25 = vpop.f32.mrb[3].mxu1  ;;  %v1912_v29 = vadd.f32 %v1462_v23, %v1199_v16  ;;  %v546_v31 = vmul.f32 %v1906_v26, %v1906_v26  ;;  %v1650_v23 = vld [vmem:[%s2038_s7 + $0x28] sm:$0xff]  }
 0x20d   :  { %v1908_v27 = vadd.f32 %v1199_v16, %v518_v25  ;;  %v544_v28 = vmul.f32 %v1904_v21, %v1904_v21  ;;  %v1647_v16 = vld [vmem:[%s2038_s7 + $0x10] sm:$0xff]  }
 0x20e   :  { %v547_v34 = vmul.f32 %v1912_v29, %v1912_v29  ;;  %v1651_v25 = vld [vmem:[%s2038_s7 + $0x30] sm:$0xff]  }
 0x20f   :  { %v534_v12 = vadd.f32 %v1908_v27, %v1904_v21  ;;  %v545_v30 = vmul.f32 %v1908_v27, %v1908_v27 }
 0x211   :  { %v535_v32 = vadd.f32 %v1906_v26, %v534_v12  ;;  %v548_v33 = vadd.f32 %v545_v30, %v544_v28  ;;  %v1652_v28 = vld [vmem:[%s2038_s7 + $0x38] sm:$0xff]   ;;  %v1653_v12 = vld [vmem:[%s2038_s7 + $0x40] sm:$0xff]   ;;  %v758_v30 = vsub.s32 0, %v659_v0 }
 0x213   :  { %v536_v35 = vadd.f32 %v1912_v29, %v535_v32  ;;  %v549_v36 = vadd.f32 %v548_v33, %v546_v31  ;;  %v766_v31 = vsub.s32 1, %v659_v0 }
 0x215   :  { %v537_v37 = vrot.slane %v536_v35, 4  ;;  %v550_v38 = vadd.f32 %v549_v36, %v547_v34 }
 0x217   :  { %v538_v39 = vadd.f32 %v537_v37, %v536_v35  ;;  %v551_v40 = vrot.slane %v550_v38, 4 }
 0x219   :  { %v539_v41 = vrot.slane %v538_v39, 2  ;;  %v552_v42 = vadd.f32 %v551_v40, %v550_v38 }
 0x21b   :  { %v540_v43 = vadd.f32 %v539_v41, %v538_v39  ;;  %v553_v44 = vrot.slane %v552_v42, 2 }
 0x21d   :  { %v541_v45 = vrot.slane %v540_v43, 1  ;;  %v554_v46 = vadd.f32 %v553_v44, %v552_v42 }
 0x21f   :  { %v542_v47 = vadd.f32 %v541_v45, %v540_v43  ;;  %v555_v48 = vrot.slane %v554_v46, 1 }
 0x221   :  { %543 = vst [vmem:[#allocation3] sm:$0x1] %v542_v47  ;;  %v556_v49 = vadd.f32 %v555_v48, %v554_v46 }
 0x223   :  { %557 = vst [vmem:[#allocation3 + $0x1] sm:$0x1] %v556_v49 }
 0x22a   :  { %v558_v50 = vld [vmem:[#allocation3] sm:$0x3] }
 0x22b   :  { %1496 = vmatmul.mubr.f32.vlgmr.msra.gmra.mrb[4].mxu1 %v558_v50 }
 0x2fe   :  { %v641_v53 = vpop.f32.mrb[4].mxu1 }
 0x2ff   :  { %v645_v54 = vmul.f32 0.001953125, %v641_v53  ;;  %v1497_v55 = vpop.f32.mrb[5].mxu1 }
 0x301   :  { %v646_v56 = vmul.f32 %v645_v54, %v645_v54 }
 0x303   :  { %v648_v57 = vrot.slane %v646_v56, 7  ;;  %v1655_v56 = vld [vmem:[%s2038_s7 + $0x50] sm:$0xff]  }
 0x305   :  { %v650_v58 = vsub.f32 %v645_v54, %v648_v57  ;;  %v1656_v57 = vld [vmem:[%s2038_s7 + $0x58] sm:$0xff]  }
 0x307   :  { %v651_v59 = vadd.f32 1e-05, %v650_v58  ;;  %v1657_v58 = vld [vmem:[%s2038_s7 + $0x60] sm:$0xff]  }
 0x309   :  { %1669 = vrsqrt.f32 %v651_v59  ;;  %v1658_v59 = vld [vmem:[%s2038_s7 + $0x68] sm:$0xff]  }
 0x313   :  { %v1670_v2 = vpop.eup %1669 }
 0x314   :  { %v661_v3 = vrot.slane %v1670_v2, %v660_v1  ;;  %v1662_v2 = vld [vmem:[%s2038_s7 + $0x88] sm:$0xff]  }
 0x316   :  { %v662_v4 = vcombine.high %v661_v3, %v661_v3 }
 0x318   :  { %v669_v7 = vrot.slane %v662_v4, %v660_v1  ;;  %v1663_v4 = vld [vmem:[%s2038_s7 + $0x90] sm:$0xff]  }
 0x31a   :  { %v671_v8 = vmul.f32 %v669_v7, %v653_v5  ;;  %v676_v9 = vmul.f32 %v675_v6, %v669_v7  ;;  %v1664_v5 = vld [vmem:[%s2038_s7 + $0x98] sm:$0xff]   ;;  %v1665_v6 = vld [vmem:[%s2038_s7 + $0xa0] sm:$0xff]   ;;  %v1666_v7 = vld [vmem:[%s2038_s7 + $0xa8] sm:$0xff]  }
 0x31c   :  { %673 = vst.msk [vmem:[#allocation4] sm:$0x1] %vm672_vm2, %v671_v8  ;;  %v677_v11 = vmul.f32 %v676_v9, %v645_v54  ;;  %v1654_v54 = vld [vmem:[%s2038_s7 + $0x48] sm:$0xff]   ;;  %v1667_v8 = vld [vmem:[%s2038_s7 + $0xb0] sm:$0xff]   ;;  %v1668_v9 = vld [vmem:[%s2038_s7 + $0xb8] sm:$0xff]  }
 0x31e   :  { %v678_v13 = vsub.f32 %v674_v10, %v677_v11 }
 0x320   :  { %679 = vst.msk [vmem:[#allocation4 + $0x1] sm:$0x1] %vm672_vm2, %v678_v13 }
 0x327   :  { %v680_v15 = vld [vmem:[#allocation4] sm:$0x3] }
 0x328   :  { %1501 = vmatmul.mubr.msk.f32.vlgmr.msra.gmra.mrb[4].mxu0 %vm682_vm3, %v680_v15 }
 0x329   :  { %1504 = vmatpush3.bf16.msra.mxu0 %v1645_v52 }
 0x32a   :  { %1505 = vmatprep.subr.bf16.mxu0 %v1646_v14 }
 0x32d   :  { %1506 = vmatpush3.bf16.msra.mxu0 %v1646_v14  ;;  %v1257_v14 = vld [vmem:[%s2041_s8] ss:$0 sm:$0xff] }
 0x32e   :  { %1507 = vmatprep.subr.bf16.mxu0 %v1647_v16 }
 0x331   :  { %1508 = vmatpush3.bf16.msra.mxu0 %v1647_v16 }
 0x332   :  { %1509 = vmatprep.subr.bf16.mxu0 %v1648_v17 }
 0x335   :  { %1510 = vmatpush3.bf16.msra.mxu0 %v1648_v17 }
 0x336   :  { %1511 = vmatprep.subr.bf16.mxu0 %v1649_v19 }
 0x339   :  { %1512 = vmatpush3.bf16.msra.mxu0 %v1649_v19 }
 0x33a   :  { %1513 = vmatprep.subr.bf16.mxu0 %v1650_v23 }
 0x33d   :  { %1514 = vmatpush3.bf16.msra.mxu0 %v1650_v23 }
 0x33e   :  { %1515 = vmatprep.subr.bf16.mxu0 %v1651_v25 }
 0x341   :  { %1516 = vmatpush3.bf16.msra.mxu0 %v1651_v25 }
 0x342   :  { %1517 = vmatprep.subr.bf16.mxu0 %v1652_v28 }
 0x345   :  { %1518 = vmatpush3.bf16.msra.mxu0 %v1652_v28 }
 0x346   :  { %1523 = vmatprep.subr.bf16.mxu0 %v1653_v12 }
 0x3fb   :  { %v752_v32 = vpop.f32.mrb[4].mxu0 }
 0x3fc   :  { %v759_v33 = vrot.slane %v752_v32, %v758_v30  ;;  %v1502_v34 = vpop.f32.mrb[5].mxu0  ;;  %v767_v35 = vrot.slane %v752_v32, %v766_v31 }
 0x3fe   :  { %v760_v36 = vmul.f32 %v1904_v21, %v759_v33  ;;  %v761_v37 = vmul.f32 %v1908_v27, %v759_v33  ;;  %v762_v38 = vmul.f32 %v1906_v26, %v759_v33  ;;  %v763_v39 = vmul.f32 %v1912_v29, %v759_v33 }
 0x400   :  { %v768_v40 = vadd.f32 %v767_v35, %v760_v36  ;;  %v769_v41 = vadd.f32 %v767_v35, %v761_v37  ;;  %v770_v42 = vadd.f32 %v767_v35, %v762_v38  ;;  %v771_v43 = vadd.f32 %v767_v35, %v763_v39 }
 0x402   :  { %vm772_vm4 = vcmp.gt.f32.partialorder %v768_v40, 0.0  ;;  %vm773_vm5 = vcmp.gt.f32.partialorder %v769_v41, 0.0  ;;  %vm774_vm6 = vcmp.gt.f32.partialorder %v770_v42, 0.0  ;;  %vm775_vm7 = vcmp.gt.f32.partialorder %v771_v43, 0.0 }
 0x403   :  { %v776_v44 = vmul.f32 0.2, %v768_v40  ;;  %v777_v45 = vmul.f32 0.2, %v769_v41  ;;  %v778_v46 = vmul.f32 0.2, %v770_v42 }
 0x404   :  { %v779_v47 = vmul.f32 0.2, %v771_v43 }
 0x405   :  { %v780_v48 = vsel %vm772_vm4, %v768_v40, %v776_v44  ;;  %v781_v21 = vsel %vm773_vm5, %v769_v41, %v777_v45  ;;  %v782_v49 = vsel %vm774_vm6, %v770_v42, %v778_v46 }
 0x406   :  { %v783_v27 = vsel %vm775_vm7, %v771_v43, %v779_v47  ;;  %785 = vst [vmem:[#allocation2 + $0x1] sm:$0xff] %v780_v48  ;;  %786 = vst [vmem:[#allocation2 + $0x9] sm:$0xff] %v781_v21  ;;  %v922_v55 = vpack.c.bf16 %v781_v21, %v780_v48 }
 0x407   :  { %787 = vst [vmem:[#allocation2 + $0x19] sm:$0xff] %v782_v49  ;;  %788 = vst [vmem:[#allocation2 + $0x21] sm:$0xff] %v783_v27  ;;  %v923_v1 = vpack.c.bf16 %v783_v27, %v782_v49 }
 0x40d   :  { %v789_v26 = vld [vmem:[#allocation2] sm:$0xff]  ;;  %v790_v29 = vld [vmem:[#allocation2 + $0x8] sm:$0xff] }
 0x40e   :  { %v791_v50 = vld [vmem:[#allocation2 + $0x18] sm:$0xff]  ;;  %v793_v51 = vpack.c.bf16 %v790_v29, %v789_v26  ;;  %v792_v52 = vld [vmem:[#allocation2 + $0x20] sm:$0xff]  ;;  %v1043_v0 = vld [vmem:[#allocation2 + $0xa] sm:$0xff] }
 0x40f   :  { %v794_v53 = vpack.c.bf16 %v792_v52, %v791_v50  ;;  %v1042_v63 = vld [vmem:[#allocation2 + $0x2] sm:$0xff]  ;;  %v1044_v10 = vld [vmem:[#allocation2 + $0x1a] sm:$0xff] }
 0x410   :  { %1519 = vmatprep.mubr.bf16.mxu0 %v793_v51  ;;  %v1046_v3 = vpack.c.bf16 %v1043_v0, %v1042_v63  ;;  %v1045_v11 = vld [vmem:[#allocation2 + $0x22] sm:$0xff] }
 0x411   :  { %1520 = vmatmul.mubr.bf16.vlgmr.msra.gmra.mrb[8].mxu0 %v794_v53  ;;  %v1047_v13 = vpack.c.bf16 %v1045_v11, %v1044_v10 }
 0x412   :  { %1524 = vmatpush3.bf16.msra.mxu0 %v1653_v12  ;;  %1539 = vmatprep.mubr.bf16.mxu0 %v922_v55 }
 0x413   :  { %1525 = vmatprep.subr.bf16.mxu0 %v1654_v54 }
 0x416   :  { %1526 = vmatpush3.bf16.msra.mxu0 %v1654_v54 }
 0x417   :  { %1527 = vmatprep.subr.bf16.mxu0 %v1655_v56 }
 0x41a   :  { %1528 = vmatpush3.bf16.msra.mxu0 %v1655_v56 }
 0x41b   :  { %1529 = vmatprep.subr.bf16.mxu0 %v1656_v57 }
 0x41e   :  { %1530 = vmatpush3.bf16.msra.mxu0 %v1656_v57 }
 0x41f   :  { %1531 = vmatprep.subr.bf16.mxu0 %v1657_v58 }
 0x422   :  { %1532 = vmatpush3.bf16.msra.mxu0 %v1657_v58 }
 0x423   :  { %1533 = vmatprep.subr.bf16.mxu0 %v1658_v59 }
 0x426   :  { %1534 = vmatpush3.bf16.msra.mxu0 %v1658_v59 }
 0x427   :  { %1535 = vmatprep.subr.bf16.mxu0 %v1659_v60 }
 0x42a   :  { %1536 = vmatpush3.bf16.msra.mxu0 %v1659_v60 }
 0x42b   :  { %1537 = vmatprep.subr.bf16.mxu0 %v1660_v61 }
 0x42e   :  { %1538 = vmatpush3.bf16.msra.mxu0 %v1660_v61 }
 0x42f   :  { %1543 = vmatprep.subr.bf16.mxu0 %v1661_v62 }
 0x431   :  { %1540 = vmatmul.mubr.bf16.vlgmr.msra.gmra.mrb[8].mxu0 %v923_v1 }
 0x432   :  { %1544 = vmatpush3.bf16.msra.mxu0 %v1661_v62  ;;  %1559 = vmatprep.mubr.bf16.mxu0 %v1046_v3 }
 0x433   :  { %1545 = vmatprep.subr.bf16.mxu0 %v1662_v2 }
 0x436   :  { %1546 = vmatpush3.bf16.msra.mxu0 %v1662_v2 }
 0x437   :  { %1547 = vmatprep.subr.bf16.mxu0 %v1663_v4 }
 0x43a   :  { %1548 = vmatpush3.bf16.msra.mxu0 %v1663_v4 }
 0x43b   :  { %1549 = vmatprep.subr.bf16.mxu0 %v1664_v5 }
 0x43e   :  { %1550 = vmatpush3.bf16.msra.mxu0 %v1664_v5 }
 0x43f   :  { %1551 = vmatprep.subr.bf16.mxu0 %v1665_v6 }
 0x442   :  { %1552 = vmatpush3.bf16.msra.mxu0 %v1665_v6 }
 0x443   :  { %1553 = vmatprep.subr.bf16.mxu0 %v1666_v7 }
 0x446   :  { %1554 = vmatpush3.bf16.msra.mxu0 %v1666_v7 }
 0x447   :  { %1555 = vmatprep.subr.bf16.mxu0 %v1667_v8 }
 0x44a   :  { %1556 = vmatpush3.bf16.msra.mxu0 %v1667_v8 }
 0x44b   :  { %1557 = vmatprep.subr.bf16.mxu0 %v1668_v9 }
 0x44e   :  { %1558 = vmatpush3.bf16.msra.mxu0 %v1668_v9 }
 0x451   :  { %1560 = vmatmul.mubr.bf16.vlgmr.msra.gmra.mrb[8].mxu0 %v1047_v13 }
 0x524   :  { %v1561_v15 = vpop.f32.mrb[8].mxu0 }
 0x525   :  { %v1591_v16 = vadd.f32 %v1561_v15, %v1257_v14  ;;  %v1147_v17 = vpop.f32.mrb[9].mxu0 }
 0x526   :  { %v1592_v19 = vadd.f32 %v1257_v14, %v1147_v17  ;;  %v1562_v23 = vpop.f32.mrb[10].mxu0 }
 0x527   :  { %v1168_v25 = vadd.f32 %v1591_v16, %v1790_v18  ;;  %v1593_v28 = vadd.f32 %v1562_v23, %v1257_v14  ;;  %v1150_v12 = vpop.f32.mrb[11].mxu0 }
 0x528   :  { %v1166_v30 = vadd.f32 %v1592_v19, %v1792_v20  ;;  %v1594_v31 = vadd.f32 %v1257_v14, %v1150_v12 }
 0x529   :  { %v1172_v32 = vmul.f32 0.70710677, %v1168_v25  ;;  %v1169_v33 = vadd.f32 %v1593_v28, %v1795_v22 }
 0x52a   :  { %v1170_v34 = vmul.f32 0.70710677, %v1166_v30  ;;  %v1167_v35 = vadd.f32 %v1594_v31, %v1798_v24 }
 0x52b   :  { %1176 = vst [vmem:[%s2042_s11 + $0x10] sm:$0xff] %v1172_v32  ;;  %v1173_v36 = vmul.f32 0.70710677, %v1169_v33 }
 0x52c   :  { %1174 = vst [vmem:[%s2042_s11] sm:$0xff] %v1170_v34  ;;  %v1171_v18 = vmul.f32 0.70710677, %v1167_v35 }
 0x52d   :  { %1177 = vst [vmem:[%s2042_s11 + $0x18] sm:$0xff] %v1173_v36 }
 0x52e   :  { %1175 = vst [vmem:[%s2042_s11 + $0x8] sm:$0xff] %v1171_v18 }

</bundles_post_ra>
